<compile_context>
chip_gen: v7x
topology: tpu7x:2x2x1
jax: 0.10.0
libtpu: 0.0.40
codegen_flags: <defaults>
</compile_context>

<pallas_src>
import functools

import jax
import jax.numpy as jnp
from jax.experimental import pallas as pl
from jax.experimental.pallas import tpu as pltpu


# ---------------------------------------------------------------------------
# Kernel bodies
# ---------------------------------------------------------------------------

def _channel_gate(v_f32, w1t_ref, b1_ref, w2t_ref, b2_ref):
    """fc1 -> relu -> fc2 -> sigmoid on the pooled (tn, C) f32 vector."""
    h = jnp.dot(v_f32, w1t_ref[...], preferred_element_type=jnp.float32) + b1_ref[...]
    h = jnp.maximum(h, 0.0)
    return jax.nn.sigmoid(
        jnp.dot(h, w2t_ref[...], preferred_element_type=jnp.float32) + b2_ref[...]
    )


def _write_output(y_ref, x, s_chn, s_spa, mode):
    """Apply both gates and write the (mode-fused) output block."""
    chn = x * s_chn                                   # (tn, C, T)
    spa = x * s_spa                                   # (tn, C, T)
    if mode == "concat":
        y_ref[:, 0, :, :] = chn.astype(y_ref.dtype)
        y_ref[:, 1, :, :] = spa.astype(y_ref.dtype)
    elif mode == "maxout":
        y_ref[...] = jnp.maximum(chn, spa).astype(y_ref.dtype)
    else:                                             # 'add' (PyTorch else-branch)
        y_ref[...] = (chn + spa).astype(y_ref.dtype)


def scse_fused_kernel(x_ref, w1t_ref, b1_ref, w2t_ref, b2_ref, wspa_ref, y_ref,
                      *, mode, inv_hw):
    """Single-pass kernel: one (tn, C, HW) block per grid step."""
    x = x_ref[...]                                    # input dtype, HW on lanes
    # channel SE: f32-accumulated global average pool (no explicit f32 x copy)
    v = jnp.sum(x, axis=-1, dtype=jnp.float32) * inv_hw            # (tn, C)
    s_chn = _channel_gate(v, w1t_ref, b1_ref, w2t_ref, b2_ref)     # (tn, C) f32
    # spatial SE: 1x1 conv over channels = VPU mul + sublane reduce (not MXU)
    wspa = wspa_ref[...].astype(x.dtype)                           # (1, C, 1)
    spa_logit = jnp.sum(x * wspa, axis=1, dtype=jnp.float32)       # (tn, HW)
    s_spa = jax.nn.sigmoid(spa_logit).astype(x.dtype)[:, None, :]
    _write_output(y_ref, x, s_chn.astype(x.dtype)[:, :, None], s_spa, mode)


def scse_two_phase_kernel(x_ref, w1t_ref, b1_ref, w2t_ref, b2_ref, wspa_ref,
                          y_ref, acc_ref, gate_ref, *, mode, inv_hw):
    """HW-tiled two-phase kernel, grid = (batch, phase, hw_tile).

    phase 0: stream x tiles, accumulate the f32 global pool in VMEM scratch;
             on the last tile compute the channel gate.
    phase 1: re-stream x tiles, apply both gates, write the output tile.
    """
    p = pl.program_id(1)
    h = pl.program_id(2)
    nh = pl.num_programs(2)
    x = x_ref[...]                                    # (1, C, T)

    @pl.when(p == 0)
    def _pool_phase():
        @pl.when(h == 0)
        def _():
            acc_ref[...] = jnp.zeros_like(acc_ref)

        acc_ref[...] += jnp.sum(x, axis=-1, dtype=jnp.float32)

        @pl.when(h == nh - 1)
        def _():
            gate_ref[...] = _channel_gate(acc_ref[...] * inv_hw,
                                          w1t_ref, b1_ref, w2t_ref, b2_ref)

    @pl.when(p == 1)
    def _apply_phase():
        wspa = wspa_ref[...].astype(x.dtype)                       # (1, C, 1)
        spa_logit = jnp.sum(x * wspa, axis=1, dtype=jnp.float32)   # (1, T)
        s_spa = jax.nn.sigmoid(spa_logit).astype(x.dtype)[:, None, :]
        s_chn = gate_ref[...].astype(x.dtype)[:, :, None]          # (1, C, 1)
        _write_output(y_ref, x, s_chn, s_spa, mode)


# ---------------------------------------------------------------------------
# Host-side planning & wrapper
# ---------------------------------------------------------------------------

def _tpu_hw():
    """Generation-aware (VMEM capacity, TensorCores/chip), with safe fallbacks."""
    vmem_cap = 64 * 1024 * 1024          # conservative: v7x per-TC VMEM
    num_cores = 2                        # conservative: assume v7x's 2 TCs
    try:
        info = pltpu.get_tpu_info()
        vmem_cap = int(getattr(info, "vmem_capacity_bytes", vmem_cap))
        for attr in ("num_cores", "tensorcores_per_chip", "num_tensorcores"):
            v = getattr(info, attr, None)
            if v:
                num_cores = int(v)
                break
    except Exception:
        pass
    return vmem_cap, max(1, min(2, num_cores))


def scse_module(x_nchw, w1, b1, w2, b2, w_spa, mode="concat",
                force_two_phase=None):
    """SCSEModule forward. PyTorch weight conventions:
    w1: (Cr, C), b1: (Cr,), w2: (C, Cr), b2: (C,), w_spa: (C,)."""
    N, C, H, W = x_nchw.shape
    HW = H * W
    Cr = w1.shape[0]
    dtype = x_nchw.dtype
    itemsize = jnp.dtype(dtype).itemsize
    out_ch = 2 * C if mode == "concat" else C          # fused modes write only C

    vmem_cap, num_cores = _tpu_hw()
    if vmem_cap >= 96 * 1024 * 1024:                    # v5e / v6e: 128 MiB VMEM
        budget, vmem_limit = 44 * 1024 * 1024, 96 * 1024 * 1024
    else:                                               # v7x: 64 MiB per TC
        budget, vmem_limit = 20 * 1024 * 1024, min(48 * 1024 * 1024,
                                                   (vmem_cap * 3) // 4)

    # Per-batch-row VMEM for the single-pass kernel: double-buffered x & y
    # blocks + gated intermediates (input dtype) + f32 reduction temporaries.
    row_bytes = (2 * (C + out_ch) * HW * itemsize
                 + 2 * C * HW * itemsize
                 + 2 * C * HW * 4)

    two_phase = force_two_phase
    if two_phase is None:
        two_phase = (row_bytes > budget) or (
            N < 2 and HW >= 4 * 128 and row_bytes > (1 << 20))

    x3 = x_nchw.reshape(N, C, HW)
    inv_hw = 1.0 / HW
    w_args = (w1.T, b1.reshape(1, Cr), w2.T, b2.reshape(1, C),
              w_spa.reshape(1, C, 1))
    # NOTE: for very small C (not a multiple of 8) the (C, HW) tiles are
    # sublane-padded; padding C to 8 on the host would recover vreg occupancy.

    if not two_phase:
        # ---- single-pass path: tile the batch axis -------------------------
        tn = max(1, min(N, budget // row_bytes))
        # keep >= 2 grid steps per TensorCore so each core still double-buffers
        min_steps = min(N, 2 * num_cores) if N >= 2 else 1
        tn = min(tn, max(1, N // min_steps))
        while N % tn:
            tn -= 1

        if mode == "concat":
            out_shape = jax.ShapeDtypeStruct((N, 2, C, HW), dtype)
            out_spec = pl.BlockSpec((tn, 2, C, HW), lambda i: (i, 0, 0, 0))
        else:
            out_shape = jax.ShapeDtypeStruct((N, C, HW), dtype)
            out_spec = pl.BlockSpec((tn, C, HW), lambda i: (i, 0, 0))

        cost = pl.CostEstimate(
            flops=6 * N * C * HW + 4 * N * C * Cr,
            transcendentals=N * (C + HW),
            bytes_accessed=(C + out_ch) * N * HW * itemsize,
        )
        out = pl.pallas_call(
            functools.partial(scse_fused_kernel, mode=mode, inv_hw=inv_hw),
            out_shape=out_shape,
            grid=(N // tn,),
            in_specs=[
                pl.BlockSpec((tn, C, HW), lambda i: (i, 0, 0)),
                pl.BlockSpec((C, Cr), lambda i: (0, 0)),
                pl.BlockSpec((1, Cr), lambda i: (0, 0)),
                pl.BlockSpec((Cr, C), lambda i: (0, 0)),
                pl.BlockSpec((1, C), lambda i: (0, 0)),
                pl.BlockSpec((1, C, 1), lambda i: (0, 0, 0)),
            ],
            out_specs=out_spec,
            compiler_params=pltpu.CompilerParams(
                dimension_semantics=("parallel",),
                vmem_limit_bytes=vmem_limit,
            ),
            cost_estimate=cost,
        )(x3, *w_args)
    else:
        # ---- two-phase path: tile the spatial (HW) axis --------------------
        HWp = ((HW + 127) // 128) * 128
        if HWp != HW:
            # TODO(synk): a fully general unpadded path would tile over H;
            # padded lanes contribute 0 to the pool and are sliced off below.
            x3 = jnp.pad(x3, ((0, 0), (0, 0), (0, HWp - HW)))
        nlanes = HWp // 128

        def tile_bytes(t):
            return (2 * (C + out_ch) * t * itemsize   # dbl-buffered x / y tiles
                    + 2 * C * t * itemsize            # gated intermediates
                    + 2 * C * t * 4)                  # f32 reduction temps

        dlanes = 1
        for cand in range(nlanes, 0, -1):
            if (nlanes % cand == 0 and tile_bytes(cand * 128) <= budget
                    and nlanes // cand >= 2):
                dlanes = cand
                break
        thw = dlanes * 128
        nhw = HWp // thw

        if mode == "concat":
            out_shape = jax.ShapeDtypeStruct((N, 2, C, HWp), dtype)
            # `h * p` keeps all of phase 0 mapped to hw-block 0, so the output
            # buffer is never flushed with garbage during the pooling phase.
            out_spec = pl.BlockSpec((1, 2, C, thw), lambda b, p, h: (b, 0, 0, h * p))
        else:
            out_shape = jax.ShapeDtypeStruct((N, C, HWp), dtype)
            out_spec = pl.BlockSpec((1, C, thw), lambda b, p, h: (b, 0, h * p))

        cost = pl.CostEstimate(
            flops=6 * N * C * HW + 4 * N * C * Cr,
            transcendentals=N * (C + HW),
            bytes_accessed=(2 * C + out_ch) * N * HWp * itemsize,
        )
        out = pl.pallas_call(
            functools.partial(scse_two_phase_kernel, mode=mode, inv_hw=inv_hw),
            out_shape=out_shape,
            grid=(N, 2, nhw),
            in_specs=[
                pl.BlockSpec((1, C, thw), lambda b, p, h: (b, 0, h)),
                pl.BlockSpec((C, Cr), lambda b, p, h: (0, 0)),
                pl.BlockSpec((1, Cr), lambda b, p, h: (0, 0)),
                pl.BlockSpec((Cr, C), lambda b, p, h: (0, 0)),
                pl.BlockSpec((1, C), lambda b, p, h: (0, 0)),
                pl.BlockSpec((1, C, 1), lambda b, p, h: (0, 0, 0)),
            ],
            out_specs=out_spec,
            scratch_shapes=[
                pltpu.VMEM((1, C), jnp.float32),      # f32 global-pool accum
                pltpu.VMEM((1, C), jnp.float32),      # channel gate
            ],
            compiler_params=pltpu.CompilerParams(
                dimension_semantics=("parallel", "arbitrary", "arbitrary"),
                vmem_limit_bytes=vmem_limit,
            ),
            cost_estimate=cost,
        )(x3, *w_args)

    out = out[..., :HW]                               # drop lane padding (no-op if none)
    if mode == "concat":
        return out.reshape(N, 2 * C, H, W)            # contiguous -> free reshape
    return out.reshape(N, C, H, W)


# ---------------------------------------------------------------------------
# Pure-JAX reference (mirrors the PyTorch SCSEModule forward)
# ---------------------------------------------------------------------------

def scse_ref(x, w1, b1, w2, b2, w_spa, mode="concat"):
    v = jnp.mean(x, axis=(2, 3))                                    # (N, C)
    h = jnp.maximum(v @ w1.T + b1, 0.0)                             # (N, Cr)
    s = jax.nn.sigmoid(h @ w2.T + b2)                               # (N, C)
    chn = x * s[:, :, None, None]
    spa_logit = jnp.sum(x * w_spa[None, :, None, None], axis=1)     # (N, H, W)
    spa = x * jax.nn.sigmoid(spa_logit)[:, None, :, :]
    if mode == "concat":
        return jnp.concatenate([chn, spa], axis=1)
    if mode == "maxout":
        return jnp.maximum(chn, spa)
    return chn + spa


if __name__ == "__main__":
    # SCSEModule(in_channels=4, reduction=2) on a (2, 4, 16, 16) input.
    N, C, H, W = 2, 4, 16, 16
    reduction = 2
    Cr = C // reduction

    key = jax.random.PRNGKey(0)
    kx, k1, k2, k3, k4, k5 = jax.random.split(key, 6)

    x = jax.random.normal(kx, (N, C, H, W), dtype=jnp.float32)

    # PyTorch Conv2d(kernel_size=1) default init: U(-1/sqrt(fan_in), 1/sqrt(fan_in))
    bound1 = 1.0 / (C ** 0.5)
    w1 = jax.random.uniform(k1, (Cr, C), jnp.float32, -bound1, bound1)
    b1 = jax.random.uniform(k2, (Cr,), jnp.float32, -bound1, bound1)
    bound2 = 1.0 / (Cr ** 0.5)
    w2 = jax.random.uniform(k3, (C, Cr), jnp.float32, -bound2, bound2)
    b2 = jax.random.uniform(k4, (C,), jnp.float32, -bound2, bound2)
    w_spa = jax.random.uniform(k5, (C,), jnp.float32, -bound1, bound1)

    # single-pass path, all three modes (maxout/add are fused in-kernel)
    for mode in ("concat", "maxout", "add"):
        y = jax.block_until_ready(scse_module(x, w1, b1, w2, b2, w_spa, mode=mode))
        y_ref = scse_ref(x, w1, b1, w2, b2, w_spa, mode=mode)
        assert y.shape == y_ref.shape, mode
        assert jnp.allclose(y, y_ref, atol=1e-5, rtol=1e-5), mode

    # force the HW-tiled two-phase fallback path (large-feature-map / N=1 path)
    for mode in ("concat", "maxout"):
        y = jax.block_until_ready(
            scse_module(x, w1, b1, w2, b2, w_spa, mode=mode, force_two_phase=True))
        y_ref = scse_ref(x, w1, b1, w2, b2, w_spa, mode=mode)
        assert y.shape == y_ref.shape, ("two_phase", mode)
        assert jnp.allclose(y, y_ref, atol=1e-5, rtol=1e-5), ("two_phase", mode)

    print("KERNEL_OK")
</pallas_src>

<mosaic_0001>
module attributes {stable_mosaic.version = 11 : i64} {
  func.func @scse_fused_kernel(%arg0: i32, %arg1: memref<1x4x256xf32, #tpu.memory_space<vmem>>, %arg2: memref<4x2xf32, #tpu.memory_space<vmem>>, %arg3: memref<1x2xf32, #tpu.memory_space<vmem>>, %arg4: memref<2x4xf32, #tpu.memory_space<vmem>>, %arg5: memref<1x4xf32, #tpu.memory_space<vmem>>, %arg6: memref<1x4x1xf32, #tpu.memory_space<vmem>>, %arg7: memref<1x2x4x256xf32, #tpu.memory_space<vmem>>) attributes {dimension_semantics = [#tpu.dimension_semantics<parallel>], iteration_bounds = array<i64: 2>, scalar_prefetch = 0 : i64, scratch_operands = 0 : i64, tpu.core_type = #tpu.core_type<tc>, window_params = [{transform_indices = @transform_0, window_bounds = array<i64: 1, 4, 256>}, {pipeline_mode = #tpu.pipeline_mode<synchronous>, transform_indices = @transform_1, window_bounds = array<i64: 4, 2>}, {pipeline_mode = #tpu.pipeline_mode<synchronous>, transform_indices = @transform_2, window_bounds = array<i64: 1, 2>}, {pipeline_mode = #tpu.pipeline_mode<synchronous>, transform_indices = @transform_3, window_bounds = array<i64: 2, 4>}, {pipeline_mode = #tpu.pipeline_mode<synchronous>, transform_indices = @transform_4, window_bounds = array<i64: 1, 4>}, {pipeline_mode = #tpu.pipeline_mode<synchronous>, transform_indices = @transform_5, window_bounds = array<i64: 1, 4, 1>}, {transform_indices = @transform_6, window_bounds = array<i64: 1, 2, 4, 256>}]} {
    %c0 = arith.constant 0 : index
    %c0_0 = arith.constant 0 : index
    %c0_1 = arith.constant 0 : index
    %0 = vector.load %arg1[%c0, %c0_0, %c0_1] : memref<1x4x256xf32, #tpu.memory_space<vmem>>, vector<1x4x256xf32>
    %cst = arith.constant dense<0.000000e+00> : vector<1x4xf32>
    %1 = vector.multi_reduction <add>, %0, %cst [2] : vector<1x4x256xf32> to vector<1x4xf32>
    %cst_2 = arith.constant 3.906250e-03 : f32
    %2 = vector.broadcast %cst_2 : f32 to vector<1x4xf32>
    %3 = arith.mulf %1, %2 : vector<1x4xf32>
    %c0_3 = arith.constant 0 : index
    %c0_4 = arith.constant 0 : index
    %4 = vector.load %arg2[%c0_3, %c0_4] : memref<4x2xf32, #tpu.memory_space<vmem>>, vector<4x2xf32>
    %cst_5 = arith.constant dense<0.000000e+00> : vector<1x2xf32>
    %5 = tpu.matmul %3, %4, %cst_5 {dimension_numbers = #tpu.dot_dimension_numbers<[1], [0], [0], [1], [0, 0, 1, 1], [], []>} : vector<1x4xf32>, vector<4x2xf32>, vector<1x2xf32> -> vector<1x2xf32>
    %c0_6 = arith.constant 0 : index
    %c0_7 = arith.constant 0 : index
    %6 = vector.load %arg3[%c0_6, %c0_7] : memref<1x2xf32, #tpu.memory_space<vmem>>, vector<1x2xf32>
    %7 = arith.addf %5, %6 : vector<1x2xf32>
    %cst_8 = arith.constant 0.000000e+00 : f32
    %8 = vector.broadcast %cst_8 : f32 to vector<1x2xf32>
    %9 = arith.maximumf %7, %8 : vector<1x2xf32>
    %c0_9 = arith.constant 0 : index
    %c0_10 = arith.constant 0 : index
    %10 = vector.load %arg4[%c0_9, %c0_10] : memref<2x4xf32, #tpu.memory_space<vmem>>, vector<2x4xf32>
    %cst_11 = arith.constant dense<0.000000e+00> : vector<1x4xf32>
    %11 = tpu.matmul %9, %10, %cst_11 {dimension_numbers = #tpu.dot_dimension_numbers<[1], [0], [0], [1], [0, 0, 1, 1], [], []>} : vector<1x2xf32>, vector<2x4xf32>, vector<1x4xf32> -> vector<1x4xf32>
    %c0_12 = arith.constant 0 : index
    %c0_13 = arith.constant 0 : index
    %12 = vector.load %arg5[%c0_12, %c0_13] : memref<1x4xf32, #tpu.memory_space<vmem>>, vector<1x4xf32>
    %13 = arith.addf %11, %12 : vector<1x4xf32>
    %14 = arith.negf %13 : vector<1x4xf32>
    %15 = math.exp %14 : vector<1x4xf32>
    %cst_14 = arith.constant 1.000000e+00 : f32
    %16 = vector.broadcast %cst_14 : f32 to vector<1x4xf32>
    %17 = arith.addf %16, %15 : vector<1x4xf32>
    %18 = arith.divf %16, %17 : vector<1x4xf32>
    %c0_15 = arith.constant 0 : index
    %c0_16 = arith.constant 0 : index
    %c0_17 = arith.constant 0 : index
    %19 = vector.load %arg6[%c0_15, %c0_16, %c0_17] : memref<1x4x1xf32, #tpu.memory_space<vmem>>, vector<1x4x1xf32>
    %20 = vector.broadcast %19 : vector<1x4x1xf32> to vector<1x4x256xf32>
    %21 = arith.mulf %0, %20 : vector<1x4x256xf32>
    %cst_18 = arith.constant dense<0.000000e+00> : vector<1x256xf32>
    %22 = vector.multi_reduction <add>, %21, %cst_18 [1] : vector<1x4x256xf32> to vector<1x256xf32>
    %23 = arith.negf %22 : vector<1x256xf32>
    %24 = math.exp %23 : vector<1x256xf32>
    %cst_19 = arith.constant 1.000000e+00 : f32
    %25 = vector.broadcast %cst_19 : f32 to vector<1x256xf32>
    %26 = arith.addf %25, %24 : vector<1x256xf32>
    %27 = arith.divf %25, %26 : vector<1x256xf32>
    %28 = vector.shape_cast %27 : vector<1x256xf32> to vector<1x1x256xf32>
    %29 = vector.shape_cast %18 : vector<1x4xf32> to vector<1x4x1xf32>
    %30 = vector.broadcast %29 : vector<1x4x1xf32> to vector<1x4x256xf32>
    %31 = arith.mulf %0, %30 : vector<1x4x256xf32>
    %32 = vector.broadcast %28 : vector<1x1x256xf32> to vector<1x4x256xf32>
    %33 = arith.mulf %0, %32 : vector<1x4x256xf32>
    %c0_20 = arith.constant 0 : index
    %c0_21 = arith.constant 0 : index
    %c0_22 = arith.constant 0 : index
    %c0_23 = arith.constant 0 : index
    %34 = vector.load %arg7[%c0_20, %c0_21, %c0_22, %c0_23] : memref<1x2x4x256xf32, #tpu.memory_space<vmem>>, vector<1x1x4x256xf32>
    %35 = vector.shape_cast %34 : vector<1x1x4x256xf32> to vector<1x4x256xf32>
    %36 = vector.shape_cast %31 : vector<1x4x256xf32> to vector<1x1x4x256xf32>
    tpu.vector_store %arg7[%c0_20, %c0_21, %c0_22, %c0_23], %36 {strides = array<i32>} : memref<1x2x4x256xf32, #tpu.memory_space<vmem>>, vector<1x1x4x256xf32>,
    %c0_24 = arith.constant 0 : index
    %c1 = arith.constant 1 : index
    %c0_25 = arith.constant 0 : index
    %c0_26 = arith.constant 0 : index
    %37 = vector.load %arg7[%c0_24, %c1, %c0_25, %c0_26] : memref<1x2x4x256xf32, #tpu.memory_space<vmem>>, vector<1x1x4x256xf32>
    %38 = vector.shape_cast %37 : vector<1x1x4x256xf32> to vector<1x4x256xf32>
    %39 = vector.shape_cast %33 : vector<1x4x256xf32> to vector<1x1x4x256xf32>
    tpu.vector_store %arg7[%c0_24, %c1, %c0_25, %c0_26], %39 {strides = array<i32>} : memref<1x2x4x256xf32, #tpu.memory_space<vmem>>, vector<1x1x4x256xf32>,
    return
  }
  func.func @transform_0(%arg0: i32) -> (i32, i32, i32) {
    %c0_i32 = arith.constant 0 : i32
    %c0_i32_0 = arith.constant 0 : i32
    %c0_i32_1 = arith.constant 0 : i32
    return %arg0, %c0_i32, %c0_i32_0 : i32, i32, i32
  }
  func.func @transform_1(%arg0: i32) -> (i32, i32) {
    %c0_i32 = arith.constant 0 : i32
    %c0_i32_0 = arith.constant 0 : i32
    %c0_i32_1 = arith.constant 0 : i32
    return %c0_i32, %c0_i32_0 : i32, i32
  }
  func.func @transform_2(%arg0: i32) -> (i32, i32) {
    %c0_i32 = arith.constant 0 : i32
    %c0_i32_0 = arith.constant 0 : i32
    %c0_i32_1 = arith.constant 0 : i32
    return %c0_i32, %c0_i32_0 : i32, i32
  }
  func.func @transform_3(%arg0: i32) -> (i32, i32) {
    %c0_i32 = arith.constant 0 : i32
    %c0_i32_0 = arith.constant 0 : i32
    %c0_i32_1 = arith.constant 0 : i32
    return %c0_i32, %c0_i32_0 : i32, i32
  }
  func.func @transform_4(%arg0: i32) -> (i32, i32) {
    %c0_i32 = arith.constant 0 : i32
    %c0_i32_0 = arith.constant 0 : i32
    %c0_i32_1 = arith.constant 0 : i32
    return %c0_i32, %c0_i32_0 : i32, i32
  }
  func.func @transform_5(%arg0: i32) -> (i32, i32, i32) {
    %c0_i32 = arith.constant 0 : i32
    %c0_i32_0 = arith.constant 0 : i32
    %c0_i32_1 = arith.constant 0 : i32
    %c0_i32_2 = arith.constant 0 : i32
    return %c0_i32, %c0_i32_0, %c0_i32_1 : i32, i32, i32
  }
  func.func @transform_6(%arg0: i32) -> (i32, i32, i32, i32) {
    %c0_i32 = arith.constant 0 : i32
    %c0_i32_0 = arith.constant 0 : i32
    %c0_i32_1 = arith.constant 0 : i32
    %c0_i32_2 = arith.constant 0 : i32
    return %arg0, %c0_i32, %c0_i32_0, %c0_i32_1 : i32, i32, i32, i32
  }
}

</mosaic_0001>

<bundles_post_ra>
// kernel: tpu_custom_call.1
= control target key start
LH: loop header
LB: loop body
LE: loop exit
PB: predicated region body
PF: predicated region fallthrough
CT: control target
= control target key end

     0   :  { %11 = vsyncpa [#allocation3], 0  ;;  %s1048_s0 = inlined_call_operand.hbm [shape: f32[2,4,256], index: 0, kind: input, shape index: {}]   ;;  %s1049_s1 = inlined_call_operand.vmem [shape: f32[4,2], index: 1, kind: input, shape index: {}]   ;;  %s1050_s2 = inlined_call_operand.vmem [shape: f32[1,2], index: 2, kind: input, shape index: {}]   ;;  %s1051_s3 = inlined_call_operand.vmem [shape: f32[2,4], index: 3, kind: input, shape index: {}]   ;;  %s1052_s4 = inlined_call_operand.vmem [shape: f32[1,4], index: 4, kind: input, shape index: {}]   ;;  %s1053_s5 = inlined_call_operand.vmem [shape: f32[1,4,1], index: 5, kind: input, shape index: {}]   ;;  %s1054_s6 = inlined_call_operand.hbm [shape: f32[2,2,4,256], index: 6, kind: output, shape index: {}]  }
   0x1   :  { %13 = vsyncpa [#allocation3 + $0x1], 0 }
   0x2   :  { %14 = vsyncpa [#allocation4], 0 }
   0x3   :  { %16 = vsyncpa [#allocation4 + $0x1], 0  ;;  %s851_s21 = smov 0   ;;  %s853_s22 = smov 0  }
   0x4   :  { %s855_s23 = smov 0   ;;  %s857_s24 = smov 0  }
   0x5 LB: > { %s872_s25 = sadd.s32 4294967295, %s806_s24   ;;  %s606_s26 = sadd.s32 4294967294, %s806_s24   ;;  %s806_s24 = sphi %s857_s24, %s1069_s24   ;;  %s802_s23 = sphi %s855_s23, %s1068_s23   ;;  %s798_s22 = sphi %s853_s22, %s1067_s22   ;;  %s794_s21 = sphi %s851_s21, %s1066_s21  }
   0x6   : > { %s876_s27 = sadd.s32 1, %s806_s24   ;;  %s29_s28 = sadd.s32 1, %s802_s23 }
   0x7   : > { %s26_s29 = ssub.s32 %s806_s24, %s876_s27  ;;  %p36_p0 = scmp.ne.s32.totalorder %s802_s23, %s798_s22 }
   0x8   : > { %p27_p1 = scmp.eq.s32.totalorder %s26_s29, 0  ;;  %p37_p2 = scmp.eq.s32.totalorder %s806_s24, 0 }
   0x9   : > { %p42_p3 = scmp.ne.s32.totalorder %s798_s22, %s794_s21  ;;  %p43_p4 = scmp.eq.s32.totalorder %s872_s25, 0 }
   0xa   : > { %s888_s30 = scalar_select %p27_p1, %s802_s23, %s29_s28  }
   0xb   : > { %p890_p5 = por %p37_p2, %p36_p0  ;;  %p894_p6 = por %p43_p4, %p42_p3 }
   0xc   : > { %p171_p7 = scmp.eq.s32.totalorder %s872_s25, 1  ;;  %p177_p8 = scmp.eq.s32.totalorder %s606_s26, 1 }
   0xd   : > { %p656_p10 = scmp.lt.s32.totalorder %s806_s24, 2  ;;  %s212_s11 = sand.u32 1, %s802_s23  }
   0xe   : > { %p901_p11 = por %p171_p7, %p36_p0  ;;  %p905_p12 = por %p177_p8, %p42_p3 }
   0xf   : > { %s628_s12 = sshll.u32 %s806_s24, 7  ;;  %s609_s13 = sshll.u32 %s212_s11, 3 }
  0x10   : > { %s1058_s9 = scalar_select %p901_p11, 1, 0 }
  0x11   : > { %s1059_s10 = scalar_select %p905_p12, 1, 0 }
  0x12   : > { %s914_s16 = scalar_lea.hbm %s1048_s0, %s628_s12  ;;  %s216_s17 = scalar_lea.vmem [#allocation2], %s609_s13 }
  0x13   : > { %s224_s18 = sshll.u32 %s216_s17, 4  ;;  %p918_p13 = pnand %p656_p10, %p890_p5  ;;  %s922_s18 = int_to_ptr.vmem [resolvable:$true] %s224_s18 }
  0x14   : > { %s213_s20 = scalar_lea.sflag [#allocation3], %s212_s11  ;;  %s710_s26 = scalar_lea.hbm %s914_s16, 128 }
  0x15   : > { %p711_p2 = scmp.ne.s32.totalorder %s914_s16, %s710_s26  ;;  %p712_p3 = pneg %p918_p13 }
  0x16   : > { %s715_s7 = scalar_lea.hbm %s1048_s0, 256  ;;  %p716_p5 = scmp.lt.u32.totalorder %s914_s16, %s1048_s0 }
  0x17   : > { %p713_p4 = pnand %p712_p3, %p711_p2  ;;  %p717_p8 = scmp.lt.u32.totalorder %s715_s7, %s710_s26 }
  0x18   : > { %p719_p9 = scmp.lt.u32.totalorder %s710_s26, %s914_s16 }
  0x19   : > { %p714_p7 = pneg %p713_p4  ;;  %p718_p10 = por %p717_p8, %p716_p5 }
  0x1b   : > { %p720_p0 = por %p719_p9, %p718_p10 }
  0x1d   : > { %p721_p1 = pnand %p720_p0, %p714_p7 }
  0x1f   : > { %724 = shalt.err (!%p721_p1)
}
  0x20   : > { %s725_s11 = scalar_lea.vmem %s922_s18, 128  ;;  %s808_s14 = smov [#allocation2]  }
  0x21   : > { %p726_p2 = scmp.ne.s32.totalorder %s922_s18, %s725_s11  ;;  %s730_s15 = sshll.u32 %s808_s14, 4  ;;  %s731_s15 = int_to_ptr.vmem [resolvable:$false] %s730_s15 }
  0x22   : > { %s732_s17 = scalar_lea.vmem %s731_s15, 256  ;;  %p733_p11 = scmp.lt.s32.totalorder %s922_s18, %s731_s15 }
  0x23   : > { %p728_p4 = pnand %p726_p2, %p712_p3  ;;  %p734_p5 = scmp.lt.s32.totalorder %s732_s17, %s725_s11 }
  0x25   : > { %p729_p12 = pneg %p728_p4  ;;  %p735_p8 = por %p734_p5, %p733_p11 }
  0x27   : > { %p736_p9 = pnand %p735_p8, %p729_p12 }
  0x29   : > { %739 = shalt.err (!%p736_p9)
}
  0x2a   : > { %651 = dma.hbm_to_vmem [thread:$0]  (!%p918_p13), %s914_s16, 128, %s922_s18, %s213_s20  }
  0x2b   : > { %p1061_p0 = scmp.lt.s32.totalorder %s806_s24, 3  ;;  %p1062_p1 = scmp.ge.s32.totalorder %s806_s24, 1 }
  0x2d   : > { %p230_p3 = pnand %p1062_p1, %p1061_p0 }
  0x2e   : > { %s956_s26 = sand.u32 (!%p230_p3), 1, %s798_s22  }
  0x2f   : > { %233 = sbr.rel (%p230_p3) target bundleno = 799 (0x31f), region = 44  ;;  %s613_s28 = sshll.u32 (!%p230_p3), %s956_s26, 3 }
  0x30   : > { %s236_s29 = scalar_lea.sflag (!%p230_p3), [#allocation3], %s956_s26  ;;  %s239_s7 = scalar_lea.vmem (!%p230_p3), [#allocation2], %s613_s28 }
  0x36   : > { %785 = dma.done.wait (%p894_p6), %s236_s29, 128  }
  0x37   : > { %787 = vsyncadd (%p894_p6), %s236_s29, 4294967168  ;;  %vm272_vm0 = vcmask 1043456   ;;  %v964_v0 = vld [vmem:[%s239_s7] sm:$0xff]  ;;  %v809_v5 = vmov 0.0   ;;  %vm810_vm1 = vmmov 0   ;;  %v282_v7 = vlaneseq  ;;  %s614_s17 = sshll.u32 %s956_s26, 4 }
  0x38   : > { %v270_v1 = vcombine.high %v964_v0, %v964_v0  ;;  %v273_v2 = vsel %vm272_vm0, %v964_v0, 0.0  ;;  %634 = vmatprep.subr.mxu0 %v809_v5  ;;  %v279_v6 = vld [vmem:[%s1049_s1] sm:$0xf]  ;;  %639 = vmatprep.subr.mxu1 %v809_v5  ;;  %vm288_vm2 = vcmask 31744   ;;  %vm371_vm3 = vcmask 1041408   ;;  %s267_s28 = scalar_lea.vmem [#allocation5], %s614_s17 }
  0x39   : > { %635 = vmatpush3.msk.msra.mxu0 %vm272_vm0, %v279_v6  ;;  %636 = vmatprep.mubr.msk.f32.mxu0 %vm810_vm1, %v809_v5  ;;  %v283_v8 = vand.u32 127, %v282_v7  ;;  %v975_v9 = vshrl.u32 %v282_v7, 7  ;;  %v365_v14 = vld [vmem:[%s1051_s3] sm:$0x3]  ;;  %v811_v16 = vmov 0   ;;  %vm367_vm4 = vcmask 15360  }
  0x3a   : > { %v274_v3 = vsel %vm272_vm0, %v270_v1, 0.0  ;;  %641 = vmatprep.mubr.msk.f32.mxu1 %vm810_vm1, %v809_v5  ;;  %640 = vmatpush3.msk.msra.mxu1 %vm371_vm3, %v365_v14  ;;  %v451_v15 = vld [vmem:[%s1053_s5] sm:$0xf]  ;;  %v812_v22 = vmov 839922192   ;;  %s533_s29 = sshll.u32 %s267_s28, 4  ;;  %s998_s29 = int_to_ptr.vmem [resolvable:$true] %s533_s29 }
  0x3b   : > { %v275_v4 = vadd.f32 %v274_v3, %v273_v2  ;;  %v286_v10 = vsub.s32 %v283_v8, %v975_v9  ;;  %696 = vset.pattern.permute.xlu0 %v811_v16  ;;  %v280_v17 = vld [vmem:[%s1050_s2] sm:$0x1]  ;;  %v457_v23 = vunpack.c.l.s4 %v812_v22  ;;  %v496_v61 = vsub.s32 0, %v975_v9  ;;  %s629_s7 = sshll.u32 %s872_s25, 8  ;;  %s520_s19 = scalar_lea.sflag [#allocation4], %s956_s26 }
  0x3c   : > { %v366_v50 = vld [vmem:[%s1052_s4] sm:$0x1]  ;;  %s1003_s8 = scalar_lea.hbm %s1054_s6, %s629_s7  ;;  %s740_s20 = scalar_lea.vmem %s998_s29, 256 }
  0x3d   : > { %276 = vadd.xlane.f32.xlu0 %v275_v4  ;;  %v458_v24 = vunpack.c.0.s8 %v457_v23  ;;  %p741_p6 = scmp.ne.s32.totalorder %s998_s29, %s740_s20  ;;  %p1063_p11 = scmp.ne.s32.totalorder %s1058_s9, 0 }
  0x3e   : > { %s813_s25 = smov [#allocation5]  }
  0x3f   : > { %v461_v25 = vsub.s32 %v458_v24, %v975_v9  ;;  %p742_p12 = pnand %p741_p6, %p1063_p11  ;;  %s744_s12 = sshll.u32 %s813_s25, 4  ;;  %s745_s12 = int_to_ptr.vmem [resolvable:$false] %s744_s12 }
  0x40   : > { %s746_s13 = scalar_lea.vmem %s745_s12, 512  ;;  %p747_p7 = scmp.lt.s32.totalorder %s998_s29, %s745_s12 }
  0x41   : > { %p743_p13 = pneg %p742_p12  ;;  %p748_p10 = scmp.lt.s32.totalorder %s746_s13, %s740_s20 }
  0x43   : > { %p749_p2 = por %p748_p10, %p747_p7 }
  0x45   : > { %p750_p4 = pnand %p749_p2, %p743_p13 }
  0x53   : > { %454 = vperm.xlu0 %696, %v451_v15  }
  0xca   : > { %v277_v11 = vpop.xlane.xlu0 %276 }
  0xcb   : > { %v278_v12 = vmul.f32 0.00390625, %v277_v11 }
  0xcd   : > { %v287_v13 = vrot.slane %v278_v12, %v286_v10 }
  0xcf   : > { %637 = vmatmul.mubr.msk.f32.vlgmr.msra.gmra.mrb[0].mxu0 %vm288_vm2, %v287_v13 }
  0xd2   : > { %v455_v26 = vpop.permute.xlu0 %454 }
  0xd3   : > { %v462_v27 = vrot.slane %v455_v26, %v461_v25 }
  0xd5   : > { %v464_v28 = vmul.f32 %v462_v27, %v964_v0 }
  0xd7   : > { %v466_v29 = vcombine.high %v464_v28, %v464_v28  ;;  %v468_v30 = vsel %vm272_vm0, %v464_v28, 0.0 }
  0xd8   : > { %v469_v32 = vrot.slane %v468_v30, 4 }
  0xd9   : > { %v475_v31 = vsel %vm272_vm0, %v466_v29, 0.0 }
  0xda   : > { %v476_v33 = vrot.slane %v475_v31, 4  ;;  %v470_v34 = vadd.f32 %v469_v32, %v468_v30 }
  0xdc   : > { %v477_v35 = vadd.f32 %v476_v33, %v475_v31  ;;  %v471_v36 = vrot.slane %v470_v34, 2 }
  0xde   : > { %v478_v37 = vrot.slane %v477_v35, 2  ;;  %v472_v38 = vadd.f32 %v471_v36, %v470_v34 }
  0xe0   : > { %v479_v39 = vadd.f32 %v478_v37, %v477_v35  ;;  %v473_v40 = vrot.slane %v472_v38, 1 }
  0xe2   : > { %v480_v41 = vrot.slane %v479_v39, 1  ;;  %v474_v42 = vadd.f32 %v473_v40, %v472_v38 }
  0xe4   : > { %v481_v43 = vadd.f32 %v480_v41, %v479_v39  ;;  %v620_v44 = vmul.f32 -1.442695, %v474_v42 }
  0xe6   : > { %v621_v45 = vmul.f32 -1.442695, %v481_v43  ;;  %698 = vpow2.f32 %v620_v44 }
  0xe8   : > { %700 = vpow2.f32 %v621_v45 }
  0xf0   : > { %v699_v46 = vpop.eup %698 }
  0xf1   : > { %v488_v48 = vadd.f32 1.0, %v699_v46 }
  0xf2   : > { %v701_v47 = vpop.eup %700 }
  0xf3   : > { %v489_v49 = vadd.f32 1.0, %v701_v47  ;;  %702 = vrcp.f32 %v488_v48 }
  0xf5   : > { %704 = vrcp.f32 %v489_v49 }
  0xfd   : > { %v703_v55 = vpop.eup %702 }
  0xff   : > { %v705_v56 = vpop.eup %704 }
 0x100   : > { %v513_v57 = vcombine.low %v703_v55, %v705_v56 }
 0x102   : > { %v515_v58 = vmul.f32 %v513_v57, %v964_v0 }
 0x104   : > { %622 = vst [vmem:[%s267_s28 + $0x8] sm:$0xff] %v515_v58 }
 0x1a2   : > { %v360_v18 = vpop.f32.mrb[0].mxu0 }
 0x1a3   : > { %v361_v19 = vadd.f32 %v360_v18, %v280_v17  ;;  %v638_v20 = vpop.f32.mrb[1].mxu0 }
 0x1a5   : > { %v364_v21 = vmax.f32 %v361_v19, 0.0 }
 0x1a7   : > { %642 = vmatmul.mubr.msk.f32.vlgmr.msra.gmra.mrb[0].mxu1 %vm367_vm4, %v364_v21 }
 0x27a   : > { %v441_v51 = vpop.f32.mrb[0].mxu1 }
 0x27b   : > { %v442_v52 = vadd.f32 %v441_v51, %v366_v50  ;;  %v643_v53 = vpop.f32.mrb[1].mxu1 }
 0x27d   : > { %v619_v54 = vmul.f32 -1.442695, %v442_v52 }
 0x27f   : > { %706 = vpow2.f32 %v619_v54 }
 0x289   : > { %v707_v59 = vpop.eup %706 }
 0x28a   : > { %v448_v60 = vadd.f32 1.0, %v707_v59 }
 0x28c   : > { %708 = vrcp.f32 %v448_v60 }
 0x296   : > { %v709_v62 = vpop.eup %708 }
 0x297   : > { %v497_v63 = vrot.slane %v709_v62, %v496_v61 }
 0x299   : > { %499 = vbcast.lane.b32.xlu1 %v497_v63, 256 }
 0x30b   : > { %v500_v1 = vpop.permute.xlu1 %499 }
 0x30c   : > { %v508_v2 = vrot.slane %v500_v1, %v461_v25 }
 0x30e   : > { %v510_v3 = vmul.f32 %v508_v2, %v964_v0 }
 0x310   : > { %516 = vst [vmem:[%s267_s28] sm:$0xff] %v510_v3 }
 0x311   : > { %753 = shalt.err (!%p750_p4)
}
 0x312   : > { %s754_s11 = scalar_lea.hbm %s1003_s8, 256  ;;  %s758_s17 = scalar_lea.hbm %s1054_s6, 512 }
 0x313   : > { %p755_p5 = scmp.ne.s32.totalorder %s1003_s8, %s754_s11  ;;  %p759_p0 = scmp.lt.u32.totalorder %s1003_s8, %s1054_s6 }
 0x314   : > { %p760_p1 = scmp.lt.u32.totalorder %s758_s17, %s754_s11  ;;  %p762_p6 = scmp.lt.u32.totalorder %s754_s11, %s1003_s8 }
 0x315   : > { %p756_p8 = pnand %p755_p5, %p1063_p11 }
 0x316   : > { %p761_p3 = por %p760_p1, %p759_p0 }
 0x317   : > { %p757_p9 = pneg %p756_p8 }
 0x318   : > { %p763_p12 = por %p762_p6, %p761_p3 }
 0x31a   : > { %p764_p13 = pnand %p763_p12, %p757_p9 }
 0x31c   : > { %767 = shalt.err (!%p764_p13)
}
 0x31d   : > { %s814_s16 = smov 128   ;;  %s815_s18 = smov 8  }
 0x31e   : > { %646 = dma.vmem_to_hbm [thread:$0]  (%p1063_p11), %s998_s29, 256, %s1003_s8, %s520_s19, %s814_s16, %s814_s16, %s815_s18  }
 0x31f PF: > { %s548_s20 = sand.u32 1, %s794_s21   ;;  %p1064_p7 = scmp.ne.s32.totalorder %s1059_s10, 0 }
 0x320   : > { %p1065_p10 = scmp.ge.s32.totalorder %s806_s24, 2  ;;  %s549_s25 = scalar_lea.sflag [#allocation4], %s548_s20 }
 0x322   : > { %p653_p2 = pnand %p1065_p10, %p1064_p7 }
 0x324   : > { %789 = dma.done.wait (!%p653_p2), %s549_s25, 256  }
 0x325   : > { %791 = vsyncadd (!%p653_p2), %s549_s25, 4294967040  ;;  %p19_p4 = scmp.ge.s32.totalorder %s876_s27, 4   ;;  %s1066_s21 = smov %s798_s22 }
 0x326   : > { %s1067_s22 = smov %s802_s23  ;;  %s1068_s23 = smov %s888_s30 }
 0x327   : > { %s1069_s24 = smov %s876_s27  ;;  %21 = sbr.rel (!%p19_p4) target bundleno = 5 (0x5), region = 90 }
 0x32e   :  { %554 = vsyncpa [#allocation3], 1 }
 0x32f   :  { %556 = vsyncpa [#allocation3 + $0x1], 1 }
 0x330   :  { %557 = vsyncpa [#allocation4], 1 }
 0x331   :  { %559 = vsyncpa [#allocation4 + $0x1], 1 }

</bundles_post_ra>
